<compile_context>
chip_gen: v5e
topology: v5e:2x2
jax: 0.10.0
libtpu: 0.0.40
codegen_flags: <defaults>
</compile_context>

<pallas_src>
import jax
import jax.numpy as jnp
from jax.experimental import pallas as pl
from jax.experimental.pallas import tpu as pltpu

_LANES = 128
_VMEM_LIMIT = 32 * 1024 * 1024  # explicit: safe on v5e/v6e/v7x, >> our tiles


# ----------------------------- kernels --------------------------------------
def _make_partial_sum_kernel(block_rows, rows, has_mask):
    """Per-tile partial sum of (p - t)^2 [* mask] into an (8,128) f32 block."""
    ragged = (rows % block_rows) != 0
    groups = block_rows // 8

    def kernel(*refs):
        if has_mask:
            p_ref, t_ref, m_ref, o_ref = refs
        else:
            p_ref, t_ref, o_ref = refs

        d = p_ref[...].astype(jnp.float32) - t_ref[...].astype(jnp.float32)
        sq = d * d
        if has_mask:
            sq = sq * m_ref[...].astype(jnp.float32)

        if ragged:
            # Mask out rows past the end of the (rows, 128) slab: the boundary
            # block's padding region contains unspecified data.
            row0 = pl.program_id(0) * block_rows
            local = jax.lax.broadcasted_iota(jnp.int32, (block_rows, _LANES), 0)
            sq = jnp.where(row0 + local < rows, sq, jnp.float32(0.0))

        # (block_rows,128) -> (groups,8,128); summing axis 0 is pure VPU
        # vreg adds (no cross-lane XLU work, no loop-carried scalar dep).
        o_ref[0] = jnp.sum(sq.reshape(groups, 8, _LANES), axis=0)

    return kernel


def _make_none_kernel(has_mask):
    """Elementwise (p - t)^2 [* mask]."""

    def kernel(*refs):
        if has_mask:
            p_ref, t_ref, m_ref, o_ref = refs
        else:
            p_ref, t_ref, o_ref = refs
        d = p_ref[...].astype(jnp.float32) - t_ref[...].astype(jnp.float32)
        sq = d * d
        if has_mask:
            sq = sq * m_ref[...].astype(jnp.float32)
        o_ref[...] = sq.astype(o_ref.dtype)

    return kernel


# ----------------------------- wrapper ---------------------------------------
def mse_loss(y_pred, y_true, mask=None, reduction="mean", max_block_rows=2048):
    """Pallas implementation of MSELoss.forward.

    Matches the torch module: loss = (y_pred - y_true)**2, optionally * mask,
    then mean / sum / none reduction ('mean' divides by total numel).
    """
    assert y_pred.shape == y_true.shape
    orig_shape = y_pred.shape
    n = int(y_pred.size)

    rows = -(-n // _LANES)  # ceil(n / 128)
    block_rows = min(((max_block_rows + 7) // 8) * 8, ((rows + 7) // 8) * 8)
    grid_n = -(-rows // block_rows)

    def to_slab(x):
        flat = jnp.reshape(x, (-1,))
        if rows * _LANES != n:
            # Fallback only when numel isn't a multiple of 128 (tiny tail pad).
            flat = jnp.pad(flat, (0, rows * _LANES - n))
        return jnp.reshape(flat, (rows, _LANES))

    has_mask = mask is not None
    operands = (to_slab(y_pred), to_slab(y_true))
    if has_mask:
        operands = operands + (to_slab(mask),)

    tile_spec = pl.BlockSpec((block_rows, _LANES), lambda i: (i, 0))
    in_specs = [tile_spec] * len(operands)
    in_bytes = sum(int(o.size) * o.dtype.itemsize for o in operands)

    if reduction in ("mean", "sum"):
        kernel = _make_partial_sum_kernel(block_rows, rows, has_mask)
        out_bytes = grid_n * 8 * _LANES * 4
        partials = pl.pallas_call(
            kernel,
            out_shape=jax.ShapeDtypeStruct((grid_n, 8, _LANES), jnp.float32),
            grid_spec=pltpu.PrefetchScalarGridSpec(
                num_scalar_prefetch=0,
                grid=(grid_n,),
                in_specs=in_specs,
                out_specs=pl.BlockSpec((1, 8, _LANES), lambda i: (i, 0, 0)),
            ),
            compiler_params=pltpu.CompilerParams(
                dimension_semantics=("parallel",),
                vmem_limit_bytes=_VMEM_LIMIT,
            ),
            cost_estimate=pl.CostEstimate(
                flops=3 * n, transcendentals=0,
                bytes_accessed=in_bytes + out_bytes),
        )(*operands)
        total = jnp.sum(partials)  # tiny glue reduce over per-tile partials
        if reduction == "mean":
            # torch's 'mean' divides by total numel (even with a mask applied).
            total = total / jnp.float32(n)
        return total.astype(jnp.float32)

    elif reduction == "none":
        kernel = _make_none_kernel(has_mask)
        out_bytes = rows * _LANES * y_pred.dtype.itemsize
        out2 = pl.pallas_call(
            kernel,
            out_shape=jax.ShapeDtypeStruct((rows, _LANES), y_pred.dtype),
            grid_spec=pltpu.PrefetchScalarGridSpec(
                num_scalar_prefetch=0,
                grid=(grid_n,),
                in_specs=in_specs,
                out_specs=tile_spec,
            ),
            compiler_params=pltpu.CompilerParams(
                dimension_semantics=("parallel",),
                vmem_limit_bytes=_VMEM_LIMIT,
            ),
            cost_estimate=pl.CostEstimate(
                flops=3 * n, transcendentals=0,
                bytes_accessed=in_bytes + out_bytes),
        )(*operands)
        flat = jnp.reshape(out2, (-1,))
        if rows * _LANES != n:
            flat = flat[:n]
        return jnp.reshape(flat, orig_shape)

    else:
        raise ValueError(f"unknown reduction: {reduction}")


# ----------------------------- main ------------------------------------------
if __name__ == "__main__":
    key = jax.random.PRNGKey(0)
    k1, k2, k3, k4, k5 = jax.random.split(key, 5)

    # MSELoss has no parameters; only activations.
    shape = (2, 4, 16, 16)  # N, C, H, W  -> numel = 2048 (lane-aligned path)
    y_pred = jax.random.normal(k1, shape, dtype=jnp.float32)
    y_true = jax.random.normal(k2, shape, dtype=jnp.float32)
    mask = (jax.random.uniform(k3, shape) > 0.5).astype(jnp.float32)

    loss_mean = mse_loss(y_pred, y_true, reduction="mean")
    loss_sum = mse_loss(y_pred, y_true, reduction="sum")
    loss_none = mse_loss(y_pred, y_true, reduction="none")
    loss_masked = mse_loss(y_pred, y_true, mask=mask, reduction="mean")

    # Ragged / non-lane-aligned shape, multiple grid blocks (exercises the
    # in-kernel boundary mask and the parallel partial-sum path).
    shape2 = (3, 5, 7, 11)  # numel = 1155 (not a multiple of 128)
    a = jax.random.normal(k4, shape2, dtype=jnp.float32)
    b = jax.random.normal(k5, shape2, dtype=jnp.float32)
    loss2_mean = mse_loss(a, b, reduction="mean", max_block_rows=8)
    loss2_sum = mse_loss(a, b, reduction="sum", max_block_rows=8)
    loss2_none = mse_loss(a, b, reduction="none", max_block_rows=8)

    jax.block_until_ready((loss_mean, loss_sum, loss_none, loss_masked,
                           loss2_mean, loss2_sum, loss2_none))

    # reference checks (plain JAX)
    ref_none = (y_pred - y_true) ** 2
    assert jnp.allclose(loss_mean, jnp.mean(ref_none), rtol=1e-5, atol=1e-5)
    assert jnp.allclose(loss_sum, jnp.sum(ref_none), rtol=1e-5, atol=1e-4)
    assert jnp.allclose(loss_none, ref_none, rtol=1e-5, atol=1e-5)
    assert jnp.allclose(loss_masked, jnp.mean(ref_none * mask), rtol=1e-5, atol=1e-5)

    ref2 = (a - b) ** 2
    assert jnp.allclose(loss2_mean, jnp.mean(ref2), rtol=1e-5, atol=1e-5)
    assert jnp.allclose(loss2_sum, jnp.sum(ref2), rtol=1e-5, atol=1e-4)
    assert jnp.allclose(loss2_none, ref2, rtol=1e-5, atol=1e-5)

    print("KERNEL_OK")
</pallas_src>

<mosaic_0001>
module attributes {stable_mosaic.version = 11 : i64} {
  func.func @kernel(%arg0: i32, %arg1: memref<16x128xf32, #tpu.memory_space<vmem>>, %arg2: memref<16x128xf32, #tpu.memory_space<vmem>>, %arg3: memref<1x8x128xf32, #tpu.memory_space<vmem>>) attributes {dimension_semantics = [#tpu.dimension_semantics<parallel>], iteration_bounds = array<i64: 1>, scalar_prefetch = 0 : i64, scratch_operands = 0 : i64, tpu.core_type = #tpu.core_type<tc>, window_params = [{transform_indices = @transform_0, window_bounds = array<i64: 16, 128>}, {transform_indices = @transform_1, window_bounds = array<i64: 16, 128>}, {transform_indices = @transform_2, window_bounds = array<i64: 1, 8, 128>}]} {
    %c0 = arith.constant 0 : index
    %c0_0 = arith.constant 0 : index
    %0 = vector.load %arg1[%c0, %c0_0] : memref<16x128xf32, #tpu.memory_space<vmem>>, vector<16x128xf32>
    %c0_1 = arith.constant 0 : index
    %c0_2 = arith.constant 0 : index
    %1 = vector.load %arg2[%c0_1, %c0_2] : memref<16x128xf32, #tpu.memory_space<vmem>>, vector<16x128xf32>
    %2 = arith.subf %0, %1 : vector<16x128xf32>
    %3 = arith.mulf %2, %2 : vector<16x128xf32>
    %4 = vector.shape_cast %3 : vector<16x128xf32> to vector<2x8x128xf32>
    %cst = arith.constant dense<0.000000e+00> : vector<8x128xf32>
    %5 = vector.multi_reduction <add>, %4, %cst [0] : vector<2x8x128xf32> to vector<8x128xf32>
    %c0_3 = arith.constant 0 : index
    %c0_4 = arith.constant 0 : index
    %c0_5 = arith.constant 0 : index
    %6 = vector.load %arg3[%c0_3, %c0_4, %c0_5] : memref<1x8x128xf32, #tpu.memory_space<vmem>>, vector<1x8x128xf32>
    %7 = vector.shape_cast %6 : vector<1x8x128xf32> to vector<8x128xf32>
    %8 = vector.shape_cast %5 : vector<8x128xf32> to vector<1x8x128xf32>
    tpu.vector_store %arg3[%c0_3, %c0_4, %c0_5], %8 {strides = array<i32>} : memref<1x8x128xf32, #tpu.memory_space<vmem>>, vector<1x8x128xf32>,
    return
  }
  func.func @transform_0(%arg0: i32) -> (i32, i32) {
    %c0_i32 = arith.constant 0 : i32
    %c0_i32_0 = arith.constant 0 : i32
    return %arg0, %c0_i32 : i32, i32
  }
  func.func @transform_1(%arg0: i32) -> (i32, i32) {
    %c0_i32 = arith.constant 0 : i32
    %c0_i32_0 = arith.constant 0 : i32
    return %arg0, %c0_i32 : i32, i32
  }
  func.func @transform_2(%arg0: i32) -> (i32, i32, i32) {
    %c0_i32 = arith.constant 0 : i32
    %c0_i32_0 = arith.constant 0 : i32
    %c0_i32_1 = arith.constant 0 : i32
    return %arg0, %c0_i32, %c0_i32_0 : i32, i32, i32
  }
}

</mosaic_0001>

<bundles_post_ra>
// kernel: tpu_custom_call.1
= control target key start
LH: loop header
LB: loop body
LE: loop exit
PB: predicated region body
PF: predicated region fallthrough
CT: control target
= control target key end

     0   :  { %7 = vsyncpa [#allocation3], 0  ;;  %s184_s0 = inlined_call_operand.hbm [shape: f32[16,128], index: 0, kind: input, shape index: {}]   ;;  %s185_s1 = inlined_call_operand.hbm [shape: f32[16,128], index: 1, kind: input, shape index: {}]   ;;  %s186_s2 = inlined_call_operand.hbm [shape: f32[1,8,128], index: 2, kind: output, shape index: {}]  }
   0x1   :  { %8 = vsyncpa [#allocation6], 0 }
   0x2   :  { %9 = vsyncpa [#allocation4], 0  ;;  %s14_s11 = sshll.u32 %s184_s0, 4  ;;  %s155_s12 = smov [#allocation2]   ;;  %s15_s11 = int_to_ptr.hbm [resolvable:$true] %s14_s11 }
   0x3   :  { %s16_s13 = sshll.u32 %s155_s12, 4  ;;  %s27_s16 = sshll.u32 %s185_s1, 4  ;;  %s17_s13 = int_to_ptr.vmem [resolvable:$true] %s16_s13  ;;  %s28_s16 = int_to_ptr.hbm [resolvable:$true] %s27_s16 }
   0x4   :  { %s156_s17 = smov 128   ;;  %s157_s18 = smov 8  }
   0x5   :  { %22 = dma.hbm_to_vmem [thread:$0]  %s15_s11, 256, %s17_s13, [#allocation3], %s156_s17, %s156_s17, %s157_s18  }
   0x6   :  { %s158_s19 = smov [#allocation5]  }
   0x7   :  { %s29_s20 = sshll.u32 %s158_s19, 4  ;;  %s30_s20 = int_to_ptr.vmem [resolvable:$true] %s29_s20 }
   0x8   :  { %35 = dma.hbm_to_vmem [thread:$0]  %s28_s16, 256, %s30_s20, [#allocation6], %s156_s17, %s156_s17, %s157_s18  }
   0x9   :  { %149 = dma.done.wait [#allocation3], 256  }
   0xa   :  { %150 = vsyncadd [#allocation3], 4294967040 }
   0xb   :  { %151 = dma.done.wait [#allocation6], 256  }
   0xc   :  { %152 = vsyncadd [#allocation6], 4294967040  ;;  %v44_v0 = vld [vmem:[#allocation2] sm:$0xff]  ;;  %v45_v1 = vld [vmem:[#allocation2 + $0x8] sm:$0xff]  ;;  %s159_s0 = smov [#allocation7]   ;;  %s61_s23 = sshll.u32 %s186_s2, 4  ;;  %s62_s23 = int_to_ptr.hbm [resolvable:$true] %s61_s23 }
   0xd   :  { %v46_v2 = vld [vmem:[#allocation5] sm:$0xff]  ;;  %v47_v3 = vld [vmem:[#allocation5 + $0x8] sm:$0xff]  ;;  %s59_s1 = sshll.u32 %s159_s0, 4  ;;  %s60_s1 = int_to_ptr.vmem [resolvable:$true] %s59_s1 }
   0xe   :  { %v48_v4 = vsub.f32 %v44_v0, %v46_v2  ;;  %v49_v5 = vsub.f32 %v45_v1, %v47_v3 }
  0x10   :  { %v50_v6 = vmul.f32 %v48_v4, %v48_v4  ;;  %v51_v7 = vmul.f32 %v49_v5, %v49_v5 }
  0x12   :  { %v52_v8 = vadd.f32 %v51_v7, %v50_v6 }
  0x14   :  { %53 = vst [vmem:[#allocation7] sm:$0xff] %v52_v8 }
  0x15   :  { %64 = dma.vmem_to_hbm [thread:$0]  %s60_s1, 128, %s62_s23, [#allocation4]  }
  0x16   :  { %153 = dma.done.wait [#allocation4], 128  }
  0x17   :  { %154 = vsyncadd [#allocation4], 4294967168 }
  0x18   :  { %69 = vsyncpa [#allocation3], 1 }
  0x19   :  { %70 = vsyncpa [#allocation6], 1 }
  0x1a   :  { %71 = vsyncpa [#allocation4], 1 }

</bundles_post_ra>
